<compile_context>
chip_gen: v6e
topology: v6e:2x2x1
jax: 0.10.0
libtpu: 0.0.40
codegen_flags: <defaults>
</compile_context>

<pallas_src>
import functools

import jax
import jax.numpy as jnp
import numpy as np
from jax.experimental import pallas as pl
from jax.experimental.pallas import tpu as pltpu


def mha_flash_kernel(x_q_ref, x_kv_ref,
                     wq_ref, wk_ref, wv_ref,
                     bq_ref, bk_ref, bv_ref,
                     wproj_ref, bproj_ref,
                     o_ref,
                     q_sc, m_sc, l_sc, acc_sc,
                     *, num_heads, scale):
    """One (batch, q-tile, kv-tile) grid step of fused QKV + attention + proj."""
    H = num_heads
    ki = pl.program_id(2)
    nk = pl.num_programs(2)

    @pl.when(ki == 0)
    def _init():
        x_q = x_q_ref[0]                                    # (TQ, C), native dtype
        tq, c = x_q.shape
        xb = jnp.broadcast_to(x_q[None], (H, tq, c))
        # Head-batched projection: (H, TQ, C) @ (H, C, hd) -> (H, TQ, hd).
        q = jnp.einsum('hqc,hcd->hqd', xb, wq_ref[...],
                       preferred_element_type=jnp.float32)
        q = q + bq_ref[...]                                 # (H, 1, hd) broadcast
        q_sc[...] = (q * scale).astype(q_sc.dtype)          # pre-scaled query
        m_sc[...] = jnp.full(m_sc.shape, -jnp.inf, dtype=m_sc.dtype)
        l_sc[...] = jnp.zeros(l_sc.shape, dtype=l_sc.dtype)
        acc_sc[...] = jnp.zeros(acc_sc.shape, dtype=acc_sc.dtype)

    # ---- K/V projection for this KV tile (native-dtype MXU operands). ----
    x_kv = x_kv_ref[0]                                      # (TK, C)
    tk, c = x_kv.shape
    xkb = jnp.broadcast_to(x_kv[None], (H, tk, c))
    k = jnp.einsum('hkc,hcd->hkd', xkb, wk_ref[...],
                   preferred_element_type=jnp.float32) + bk_ref[...]
    v = jnp.einsum('hkc,hcd->hkd', xkb, wv_ref[...],
                   preferred_element_type=jnp.float32) + bv_ref[...]
    k = k.astype(x_kv.dtype)
    v = v.astype(x_kv.dtype)

    # ---- scores: contract head_dim directly, no explicit K transpose. ----
    s = jnp.einsum('hqd,hkd->hqk', q_sc[...], k,
                   preferred_element_type=jnp.float32)      # (H, TQ, TK)

    # ---- online (flash) softmax accumulation; running stats kept in f32. ----
    m_prev = m_sc[...]
    m_new = jnp.maximum(m_prev, jnp.max(s, axis=-1, keepdims=True))
    alpha = jnp.exp(m_prev - m_new)
    p = jnp.exp(s - m_new)
    l_sc[...] = alpha * l_sc[...] + jnp.sum(p, axis=-1, keepdims=True)
    acc_sc[...] = alpha * acc_sc[...] + jnp.einsum(
        'hqk,hkd->hqd', p.astype(v.dtype), v, preferred_element_type=jnp.float32)
    m_sc[...] = m_new

    @pl.when(ki == nk - 1)
    def _finalize():
        # Deferred softmax normalization: one reciprocal per (head, q-row)
        # instead of an NxN divide.  approx=True would move it to the EUP;
        # kept exact so the self-test holds tight f32 tolerances.
        inv_l = pl.reciprocal(l_sc[...], approx=False)      # (H, TQ, 1)
        ctx = (acc_sc[...] * inv_l).astype(wproj_ref.dtype)  # (H, TQ, hd)
        # Per-head output-projection accumulation (no head concat).
        out = jnp.dot(ctx[0], wproj_ref[0], preferred_element_type=jnp.float32)
        for h in range(1, H):
            out = out + jnp.dot(ctx[h], wproj_ref[h],
                                preferred_element_type=jnp.float32)
        out = out + bproj_ref[0]
        o_ref[0] = out.astype(o_ref.dtype)


def multi_head_attention(x, wqkv_t, bqkv, wproj_t, bproj, num_heads,
                         block_q=128, block_kv=128):
    """Fused MHA forward.

    x       : (B, N, C)
    wqkv_t  : (C, 3C)  == torch qkv.weight.T
    bqkv    : (3C,)
    wproj_t : (C, C)   == torch proj.weight.T
    bproj   : (C,)

    block_q / block_kv: sequence tile sizes (clamped to N; N must be divisible
    by them).  128 matches v5e's 128-wide MXU; 256 is a better fit for the
    256x256 MXU on v6e / v7x when N allows it.
    """
    B, N, C = x.shape
    H = num_heads
    hd = C // H
    assert H * hd == C, "dim must be divisible by num_heads"
    scale = hd ** (-0.5)

    block_q = min(block_q, N)
    block_kv = min(block_kv, N)
    assert N % block_q == 0 and N % block_kv == 0, (
        "N must be divisible by the sequence tile sizes")
    nq = N // block_q
    nk = N // block_kv

    # Re-pack the fused qkv weight head-major: (C, 3C) -> three (H, C, hd).
    wq = wqkv_t[:, 0 * C:1 * C].reshape(C, H, hd).transpose(1, 0, 2)
    wk = wqkv_t[:, 1 * C:2 * C].reshape(C, H, hd).transpose(1, 0, 2)
    wv = wqkv_t[:, 2 * C:3 * C].reshape(C, H, hd).transpose(1, 0, 2)
    bq = bqkv[0 * C:1 * C].reshape(H, 1, hd)
    bk = bqkv[1 * C:2 * C].reshape(H, 1, hd)
    bv = bqkv[2 * C:3 * C].reshape(H, 1, hd)
    wp = wproj_t.reshape(H, hd, C)            # proj rows grouped by head
    bp = bproj.reshape(1, C)

    kernel = functools.partial(mha_flash_kernel, num_heads=H, scale=scale)

    # Advisory cost estimate so XLA schedules the fused kernel sensibly.
    isz = x.dtype.itemsize
    flops = 2 * B * N * C * 3 * C + 4 * B * H * N * N * hd + 2 * B * N * C * C
    transcendentals = B * H * N * N
    bytes_accessed = isz * (B * N * C * (1 + nq) + B * N * C
                            + 3 * C * C + C * C + 4 * C)

    grid_spec = pltpu.PrefetchScalarGridSpec(
        num_scalar_prefetch=0,
        grid=(B, nq, nk),
        in_specs=[
            # q-side x tile and kv-side x tile (same array, two windows).
            pl.BlockSpec((1, block_q, C), lambda b, qi, ki: (b, qi, 0)),
            pl.BlockSpec((1, block_kv, C), lambda b, qi, ki: (b, ki, 0)),
            # Weights / biases: constant index maps -> fetched once, reused.
            pl.BlockSpec((H, C, hd), lambda b, qi, ki: (0, 0, 0)),
            pl.BlockSpec((H, C, hd), lambda b, qi, ki: (0, 0, 0)),
            pl.BlockSpec((H, C, hd), lambda b, qi, ki: (0, 0, 0)),
            pl.BlockSpec((H, 1, hd), lambda b, qi, ki: (0, 0, 0)),
            pl.BlockSpec((H, 1, hd), lambda b, qi, ki: (0, 0, 0)),
            pl.BlockSpec((H, 1, hd), lambda b, qi, ki: (0, 0, 0)),
            pl.BlockSpec((H, hd, C), lambda b, qi, ki: (0, 0, 0)),
            pl.BlockSpec((1, C), lambda b, qi, ki: (0, 0)),
        ],
        out_specs=pl.BlockSpec((1, block_q, C), lambda b, qi, ki: (b, qi, 0)),
        scratch_shapes=[
            pltpu.VMEM((H, block_q, hd), x.dtype),        # pre-scaled Q tile
            pltpu.VMEM((H, block_q, 1), jnp.float32),     # running max
            pltpu.VMEM((H, block_q, 1), jnp.float32),     # running denominator
            pltpu.VMEM((H, block_q, hd), jnp.float32),    # output accumulator
        ],
    )

    return pl.pallas_call(
        kernel,
        out_shape=jax.ShapeDtypeStruct((B, N, C), x.dtype),
        grid_spec=grid_spec,
        compiler_params=pltpu.CompilerParams(
            dimension_semantics=("parallel", "parallel", "arbitrary"),
            vmem_limit_bytes=32 * 1024 * 1024),
        cost_estimate=pl.CostEstimate(
            flops=flops, transcendentals=transcendentals,
            bytes_accessed=bytes_accessed),
    )(x, x, wq, wk, wv, bq, bk, bv, wp, bp)


def reference(x, wqkv_t, bqkv, wproj_t, bproj, num_heads):
    """Pure-JAX replica of the PyTorch forward (eval mode, mask=None)."""
    B, N, C = x.shape
    hd = C // num_heads
    qkv = x @ wqkv_t + bqkv                                 # (B, N, 3C)
    qkv = qkv.reshape(B, N, 3, num_heads, hd).transpose(2, 0, 3, 1, 4)
    q, k, v = qkv[0], qkv[1], qkv[2]                        # (B, H, N, hd)
    attn = jnp.einsum('bhnd,bhmd->bhnm', q, k) * (hd ** -0.5)
    attn = jax.nn.softmax(attn, axis=-1)
    out = jnp.einsum('bhnm,bhmd->bhnd', attn, v)
    out = out.transpose(0, 2, 1, 3).reshape(B, N, C)
    return out @ wproj_t + bproj


if __name__ == "__main__":
    B, N, C, H = 2, 16, 32, 4   # dim=32, num_heads=4 -> head_dim=8

    key = jax.random.PRNGKey(0)
    kx, kw1, kb1, kw2, kb2 = jax.random.split(key, 5)

    # Deterministic parameter init (PyTorch-Linear-style uniform(+-1/sqrt(fan_in))).
    bound = 1.0 / (C ** 0.5)
    x = jax.random.normal(kx, (B, N, C), dtype=jnp.float32)
    wqkv_t = jax.random.uniform(kw1, (C, 3 * C), jnp.float32, -bound, bound)
    bqkv = jax.random.uniform(kb1, (3 * C,), jnp.float32, -bound, bound)
    wproj_t = jax.random.uniform(kw2, (C, C), jnp.float32, -bound, bound)
    bproj = jax.random.uniform(kb2, (C,), jnp.float32, -bound, bound)

    # Small tiles so the test exercises the multi-tile online-softmax path
    # (grid = (2, 2, 2)); production defaults are 128 / 256.
    out = multi_head_attention(x, wqkv_t, bqkv, wproj_t, bproj, num_heads=H,
                               block_q=8, block_kv=8)
    out = jax.block_until_ready(out)

    ref = reference(x, wqkv_t, bqkv, wproj_t, bproj, H)
    np.testing.assert_allclose(np.asarray(out), np.asarray(ref),
                               rtol=1e-4, atol=1e-5)

    print("KERNEL_OK")
</pallas_src>

<mosaic_0001>
module attributes {stable_mosaic.version = 11 : i64} {
  func.func @mha_flash_kernel(%arg0: i32, %arg1: i32, %arg2: i32, %arg3: memref<1x8x32xf32, #tpu.memory_space<vmem>>, %arg4: memref<1x8x32xf32, #tpu.memory_space<vmem>>, %arg5: memref<4x32x8xf32, #tpu.memory_space<vmem>>, %arg6: memref<4x32x8xf32, #tpu.memory_space<vmem>>, %arg7: memref<4x32x8xf32, #tpu.memory_space<vmem>>, %arg8: memref<4x1x8xf32, #tpu.memory_space<vmem>>, %arg9: memref<4x1x8xf32, #tpu.memory_space<vmem>>, %arg10: memref<4x1x8xf32, #tpu.memory_space<vmem>>, %arg11: memref<4x8x32xf32, #tpu.memory_space<vmem>>, %arg12: memref<1x32xf32, #tpu.memory_space<vmem>>, %arg13: memref<1x8x32xf32, #tpu.memory_space<vmem>>, %arg14: memref<4x8x8xf32, #tpu.memory_space<vmem>>, %arg15: memref<4x8x1xf32, #tpu.memory_space<vmem>>, %arg16: memref<4x8x1xf32, #tpu.memory_space<vmem>>, %arg17: memref<4x8x8xf32, #tpu.memory_space<vmem>>) attributes {dimension_semantics = [#tpu.dimension_semantics<parallel>, #tpu.dimension_semantics<parallel>, #tpu.dimension_semantics<arbitrary>], iteration_bounds = array<i64: 2, 2, 2>, scalar_prefetch = 0 : i64, scratch_operands = 4 : i64, tpu.core_type = #tpu.core_type<tc>, window_params = [{transform_indices = @transform_0, window_bounds = array<i64: 1, 8, 32>}, {transform_indices = @transform_1, window_bounds = array<i64: 1, 8, 32>}, {pipeline_mode = #tpu.pipeline_mode<synchronous>, transform_indices = @transform_2, window_bounds = array<i64: 4, 32, 8>}, {pipeline_mode = #tpu.pipeline_mode<synchronous>, transform_indices = @transform_3, window_bounds = array<i64: 4, 32, 8>}, {pipeline_mode = #tpu.pipeline_mode<synchronous>, transform_indices = @transform_4, window_bounds = array<i64: 4, 32, 8>}, {pipeline_mode = #tpu.pipeline_mode<synchronous>, transform_indices = @transform_5, window_bounds = array<i64: 4, 1, 8>}, {pipeline_mode = #tpu.pipeline_mode<synchronous>, transform_indices = @transform_6, window_bounds = array<i64: 4, 1, 8>}, {pipeline_mode = #tpu.pipeline_mode<synchronous>, transform_indices = @transform_7, window_bounds = array<i64: 4, 1, 8>}, {pipeline_mode = #tpu.pipeline_mode<synchronous>, transform_indices = @transform_8, window_bounds = array<i64: 4, 8, 32>}, {pipeline_mode = #tpu.pipeline_mode<synchronous>, transform_indices = @transform_9, window_bounds = array<i64: 1, 32>}, {transform_indices = @transform_10, window_bounds = array<i64: 1, 8, 32>}]} {
    %c0_i32 = arith.constant 0 : i32
    %0 = arith.cmpi eq, %arg2, %c0_i32 : i32
    %1 = arith.extui %0 : i1 to i32
    %c0_i32_0 = arith.constant 0 : i32
    %2 = arith.cmpi ne, %1, %c0_i32_0 : i32
    scf.if %2 {
      %c0_42 = arith.constant 0 : index
      %c0_43 = arith.constant 0 : index
      %c0_44 = arith.constant 0 : index
      %45 = vector.load %arg3[%c0_42, %c0_43, %c0_44] : memref<1x8x32xf32, #tpu.memory_space<vmem>>, vector<1x8x32xf32>
      %46 = vector.shape_cast %45 : vector<1x8x32xf32> to vector<8x32xf32>
      %47 = vector.shape_cast %46 : vector<8x32xf32> to vector<1x8x32xf32>
      %48 = vector.shape_cast %47 : vector<1x8x32xf32> to vector<1x8x32xf32>
      %49 = vector.broadcast %48 : vector<1x8x32xf32> to vector<4x8x32xf32>
      %c0_45 = arith.constant 0 : index
      %c0_46 = arith.constant 0 : index
      %c0_47 = arith.constant 0 : index
      %50 = vector.load %arg5[%c0_45, %c0_46, %c0_47] : memref<4x32x8xf32, #tpu.memory_space<vmem>>, vector<4x32x8xf32>
      "tpu.trace_start"() <{level = 10 : i32, message = "hqc,hcd->hqd"}> : () -> ()
      %cst_48 = arith.constant dense<0.000000e+00> : vector<4x8x8xf32>
      %51 = tpu.matmul %49, %50, %cst_48 {dimension_numbers = #tpu.dot_dimension_numbers<[2], [1], [1], [2], [0, 0, 0, 1, 1, 2], [0], [0]>} : vector<4x8x32xf32>, vector<4x32x8xf32>, vector<4x8x8xf32> -> vector<4x8x8xf32>
      "tpu.trace_stop"() : () -> ()
      %c0_49 = arith.constant 0 : index
      %c0_50 = arith.constant 0 : index
      %c0_51 = arith.constant 0 : index
      %52 = vector.load %arg8[%c0_49, %c0_50, %c0_51] : memref<4x1x8xf32, #tpu.memory_space<vmem>>, vector<4x1x8xf32>
      %53 = vector.broadcast %52 : vector<4x1x8xf32> to vector<4x8x8xf32>
      %54 = arith.addf %51, %53 : vector<4x8x8xf32>
      %cst_52 = arith.constant 0.353553385 : f32
      %55 = vector.broadcast %cst_52 : f32 to vector<4x8x8xf32>
      %56 = arith.mulf %54, %55 : vector<4x8x8xf32>
      %c0_53 = arith.constant 0 : index
      %c0_54 = arith.constant 0 : index
      %c0_55 = arith.constant 0 : index
      %57 = vector.load %arg14[%c0_53, %c0_54, %c0_55] : memref<4x8x8xf32, #tpu.memory_space<vmem>>, vector<4x8x8xf32>
      tpu.vector_store %arg14[%c0_53, %c0_54, %c0_55], %56 {strides = array<i32>} : memref<4x8x8xf32, #tpu.memory_space<vmem>>, vector<4x8x8xf32>,
      %cst_56 = arith.constant 0xFF800000 : f32
      %58 = vector.broadcast %cst_56 : f32 to vector<4x8x1xf32>
      %c0_57 = arith.constant 0 : index
      %c0_58 = arith.constant 0 : index
      %c0_59 = arith.constant 0 : index
      %59 = vector.load %arg15[%c0_57, %c0_58, %c0_59] : memref<4x8x1xf32, #tpu.memory_space<vmem>>, vector<4x8x1xf32>
      tpu.vector_store %arg15[%c0_57, %c0_58, %c0_59], %58 {strides = array<i32>} : memref<4x8x1xf32, #tpu.memory_space<vmem>>, vector<4x8x1xf32>,
      %cst_60 = arith.constant 0.000000e+00 : f32
      %60 = vector.broadcast %cst_60 : f32 to vector<4x8x1xf32>
      %c0_61 = arith.constant 0 : index
      %c0_62 = arith.constant 0 : index
      %c0_63 = arith.constant 0 : index
      %61 = vector.load %arg16[%c0_61, %c0_62, %c0_63] : memref<4x8x1xf32, #tpu.memory_space<vmem>>, vector<4x8x1xf32>
      tpu.vector_store %arg16[%c0_61, %c0_62, %c0_63], %60 {strides = array<i32>} : memref<4x8x1xf32, #tpu.memory_space<vmem>>, vector<4x8x1xf32>,
      %cst_64 = arith.constant 0.000000e+00 : f32
      %62 = vector.broadcast %cst_64 : f32 to vector<4x8x8xf32>
      %c0_65 = arith.constant 0 : index
      %c0_66 = arith.constant 0 : index
      %c0_67 = arith.constant 0 : index
      %63 = vector.load %arg17[%c0_65, %c0_66, %c0_67] : memref<4x8x8xf32, #tpu.memory_space<vmem>>, vector<4x8x8xf32>
      tpu.vector_store %arg17[%c0_65, %c0_66, %c0_67], %62 {strides = array<i32>} : memref<4x8x8xf32, #tpu.memory_space<vmem>>, vector<4x8x8xf32>,
    } else {
    }
    %c0 = arith.constant 0 : index
    %c0_1 = arith.constant 0 : index
    %c0_2 = arith.constant 0 : index
    %3 = vector.load %arg4[%c0, %c0_1, %c0_2] : memref<1x8x32xf32, #tpu.memory_space<vmem>>, vector<1x8x32xf32>
    %4 = vector.shape_cast %3 : vector<1x8x32xf32> to vector<8x32xf32>
    %5 = vector.shape_cast %4 : vector<8x32xf32> to vector<1x8x32xf32>
    %6 = vector.shape_cast %5 : vector<1x8x32xf32> to vector<1x8x32xf32>
    %7 = vector.broadcast %6 : vector<1x8x32xf32> to vector<4x8x32xf32>
    %c0_3 = arith.constant 0 : index
    %c0_4 = arith.constant 0 : index
    %c0_5 = arith.constant 0 : index
    %8 = vector.load %arg6[%c0_3, %c0_4, %c0_5] : memref<4x32x8xf32, #tpu.memory_space<vmem>>, vector<4x32x8xf32>
    "tpu.trace_start"() <{level = 10 : i32, message = "hkc,hcd->hkd"}> : () -> ()
    %cst = arith.constant dense<0.000000e+00> : vector<4x8x8xf32>
    %9 = tpu.matmul %7, %8, %cst {dimension_numbers = #tpu.dot_dimension_numbers<[2], [1], [1], [2], [0, 0, 0, 1, 1, 2], [0], [0]>} : vector<4x8x32xf32>, vector<4x32x8xf32>, vector<4x8x8xf32> -> vector<4x8x8xf32>
    "tpu.trace_stop"() : () -> ()
    %c0_6 = arith.constant 0 : index
    %c0_7 = arith.constant 0 : index
    %c0_8 = arith.constant 0 : index
    %10 = vector.load %arg9[%c0_6, %c0_7, %c0_8] : memref<4x1x8xf32, #tpu.memory_space<vmem>>, vector<4x1x8xf32>
    %11 = vector.broadcast %10 : vector<4x1x8xf32> to vector<4x8x8xf32>
    %12 = arith.addf %9, %11 : vector<4x8x8xf32>
    %c0_9 = arith.constant 0 : index
    %c0_10 = arith.constant 0 : index
    %c0_11 = arith.constant 0 : index
    %13 = vector.load %arg7[%c0_9, %c0_10, %c0_11] : memref<4x32x8xf32, #tpu.memory_space<vmem>>, vector<4x32x8xf32>
    "tpu.trace_start"() <{level = 10 : i32, message = "hkc,hcd->hkd"}> : () -> ()
    %cst_12 = arith.constant dense<0.000000e+00> : vector<4x8x8xf32>
    %14 = tpu.matmul %7, %13, %cst_12 {dimension_numbers = #tpu.dot_dimension_numbers<[2], [1], [1], [2], [0, 0, 0, 1, 1, 2], [0], [0]>} : vector<4x8x32xf32>, vector<4x32x8xf32>, vector<4x8x8xf32> -> vector<4x8x8xf32>
    "tpu.trace_stop"() : () -> ()
    %c0_13 = arith.constant 0 : index
    %c0_14 = arith.constant 0 : index
    %c0_15 = arith.constant 0 : index
    %15 = vector.load %arg10[%c0_13, %c0_14, %c0_15] : memref<4x1x8xf32, #tpu.memory_space<vmem>>, vector<4x1x8xf32>
    %16 = vector.broadcast %15 : vector<4x1x8xf32> to vector<4x8x8xf32>
    %17 = arith.addf %14, %16 : vector<4x8x8xf32>
    %c0_16 = arith.constant 0 : index
    %c0_17 = arith.constant 0 : index
    %c0_18 = arith.constant 0 : index
    %18 = vector.load %arg14[%c0_16, %c0_17, %c0_18] : memref<4x8x8xf32, #tpu.memory_space<vmem>>, vector<4x8x8xf32>
    "tpu.trace_start"() <{level = 10 : i32, message = "hqd,hkd->hqk"}> : () -> ()
    %cst_19 = arith.constant dense<0.000000e+00> : vector<4x8x8xf32>
    %19 = tpu.matmul %18, %12, %cst_19 {dimension_numbers = #tpu.dot_dimension_numbers<[2], [2], [1], [1], [0, 0, 0, 1, 1, 1], [0], [0]>} : vector<4x8x8xf32>, vector<4x8x8xf32>, vector<4x8x8xf32> -> vector<4x8x8xf32>
    "tpu.trace_stop"() : () -> ()
    %c0_20 = arith.constant 0 : index
    %c0_21 = arith.constant 0 : index
    %c0_22 = arith.constant 0 : index
    %20 = vector.load %arg15[%c0_20, %c0_21, %c0_22] : memref<4x8x1xf32, #tpu.memory_space<vmem>>, vector<4x8x1xf32>
    %cst_23 = arith.constant dense<0xFF800000> : vector<4x8xf32>
    %21 = vector.multi_reduction <maximumf>, %19, %cst_23 [2] : vector<4x8x8xf32> to vector<4x8xf32>
    %22 = vector.shape_cast %21 : vector<4x8xf32> to vector<4x8x1xf32>
    %23 = arith.maximumf %20, %22 : vector<4x8x1xf32>
    %24 = arith.subf %20, %23 : vector<4x8x1xf32>
    %25 = math.exp %24 : vector<4x8x1xf32>
    %26 = vector.broadcast %23 : vector<4x8x1xf32> to vector<4x8x8xf32>
    %27 = arith.subf %19, %26 : vector<4x8x8xf32>
    %28 = math.exp %27 : vector<4x8x8xf32>
    %c0_24 = arith.constant 0 : index
    %c0_25 = arith.constant 0 : index
    %c0_26 = arith.constant 0 : index
    %29 = vector.load %arg16[%c0_24, %c0_25, %c0_26] : memref<4x8x1xf32, #tpu.memory_space<vmem>>, vector<4x8x1xf32>
    %30 = arith.mulf %25, %29 : vector<4x8x1xf32>
    %cst_27 = arith.constant dense<0.000000e+00> : vector<4x8xf32>
    %31 = vector.multi_reduction <add>, %28, %cst_27 [2] : vector<4x8x8xf32> to vector<4x8xf32>
    %32 = vector.shape_cast %31 : vector<4x8xf32> to vector<4x8x1xf32>
    %33 = arith.addf %30, %32 : vector<4x8x1xf32>
    %c0_28 = arith.constant 0 : index
    %c0_29 = arith.constant 0 : index
    %c0_30 = arith.constant 0 : index
    %34 = vector.load %arg16[%c0_28, %c0_29, %c0_30] : memref<4x8x1xf32, #tpu.memory_space<vmem>>, vector<4x8x1xf32>
    tpu.vector_store %arg16[%c0_28, %c0_29, %c0_30], %33 {strides = array<i32>} : memref<4x8x1xf32, #tpu.memory_space<vmem>>, vector<4x8x1xf32>,
    %c0_31 = arith.constant 0 : index
    %c0_32 = arith.constant 0 : index
    %c0_33 = arith.constant 0 : index
    %35 = vector.load %arg17[%c0_31, %c0_32, %c0_33] : memref<4x8x8xf32, #tpu.memory_space<vmem>>, vector<4x8x8xf32>
    %36 = vector.broadcast %25 : vector<4x8x1xf32> to vector<4x8x8xf32>
    %37 = arith.mulf %36, %35 : vector<4x8x8xf32>
    "tpu.trace_start"() <{level = 10 : i32, message = "hqk,hkd->hqd"}> : () -> ()
    %cst_34 = arith.constant dense<0.000000e+00> : vector<4x8x8xf32>
    %38 = tpu.matmul %28, %17, %cst_34 {dimension_numbers = #tpu.dot_dimension_numbers<[2], [1], [1], [2], [0, 0, 0, 1, 1, 2], [0], [0]>} : vector<4x8x8xf32>, vector<4x8x8xf32>, vector<4x8x8xf32> -> vector<4x8x8xf32>
    "tpu.trace_stop"() : () -> ()
    %39 = arith.addf %37, %38 : vector<4x8x8xf32>
    %c0_35 = arith.constant 0 : index
    %c0_36 = arith.constant 0 : index
    %c0_37 = arith.constant 0 : index
    %40 = vector.load %arg17[%c0_35, %c0_36, %c0_37] : memref<4x8x8xf32, #tpu.memory_space<vmem>>, vector<4x8x8xf32>
    tpu.vector_store %arg17[%c0_35, %c0_36, %c0_37], %39 {strides = array<i32>} : memref<4x8x8xf32, #tpu.memory_space<vmem>>, vector<4x8x8xf32>,
    %c0_38 = arith.constant 0 : index
    %c0_39 = arith.constant 0 : index
    %c0_40 = arith.constant 0 : index
    %41 = vector.load %arg15[%c0_38, %c0_39, %c0_40] : memref<4x8x1xf32, #tpu.memory_space<vmem>>, vector<4x8x1xf32>
    tpu.vector_store %arg15[%c0_38, %c0_39, %c0_40], %23 {strides = array<i32>} : memref<4x8x1xf32, #tpu.memory_space<vmem>>, vector<4x8x1xf32>,
    %c1_i32 = arith.constant 1 : i32
    %42 = arith.cmpi eq, %arg2, %c1_i32 : i32
    %43 = arith.extui %42 : i1 to i32
    %c0_i32_41 = arith.constant 0 : i32
    %44 = arith.cmpi ne, %43, %c0_i32_41 : i32
    scf.if %44 {
      %c0_42 = arith.constant 0 : index
      %c0_43 = arith.constant 0 : index
      %c0_44 = arith.constant 0 : index
      %45 = vector.load %arg16[%c0_42, %c0_43, %c0_44] : memref<4x8x1xf32, #tpu.memory_space<vmem>>, vector<4x8x1xf32>
      %46 = tpu.reciprocal %45 : vector<4x8x1xf32> -> vector<4x8x1xf32>
      %c0_45 = arith.constant 0 : index
      %c0_46 = arith.constant 0 : index
      %c0_47 = arith.constant 0 : index
      %47 = vector.load %arg17[%c0_45, %c0_46, %c0_47] : memref<4x8x8xf32, #tpu.memory_space<vmem>>, vector<4x8x8xf32>
      %48 = vector.broadcast %46 : vector<4x8x1xf32> to vector<4x8x8xf32>
      %49 = arith.mulf %47, %48 : vector<4x8x8xf32>
      %50 = vector.extract_strided_slice %49 {offsets = [0, 0, 0], sizes = [1, 8, 8], strides = [1, 1, 1]} : vector<4x8x8xf32> to vector<1x8x8xf32>
      %51 = vector.shape_cast %50 : vector<1x8x8xf32> to vector<8x8xf32>
      %c0_48 = arith.constant 0 : index
      %c0_49 = arith.constant 0 : index
      %c0_50 = arith.constant 0 : index
      %52 = vector.load %arg11[%c0_48, %c0_49, %c0_50] : memref<4x8x32xf32, #tpu.memory_space<vmem>>, vector<1x8x32xf32>
      %53 = vector.shape_cast %52 : vector<1x8x32xf32> to vector<8x32xf32>
      %cst_51 = arith.constant dense<0.000000e+00> : vector<8x32xf32>
      %54 = tpu.matmul %51, %53, %cst_51 {dimension_numbers = #tpu.dot_dimension_numbers<[1], [0], [0], [1], [0, 0, 1, 1], [], []>} : vector<8x8xf32>, vector<8x32xf32>, vector<8x32xf32> -> vector<8x32xf32>
      %55 = vector.extract_strided_slice %49 {offsets = [1, 0, 0], sizes = [1, 8, 8], strides = [1, 1, 1]} : vector<4x8x8xf32> to vector<1x8x8xf32>
      %56 = vector.shape_cast %55 : vector<1x8x8xf32> to vector<8x8xf32>
      %c1 = arith.constant 1 : index
      %c0_52 = arith.constant 0 : index
      %c0_53 = arith.constant 0 : index
      %57 = vector.load %arg11[%c1, %c0_52, %c0_53] : memref<4x8x32xf32, #tpu.memory_space<vmem>>, vector<1x8x32xf32>
      %58 = vector.shape_cast %57 : vector<1x8x32xf32> to vector<8x32xf32>
      %cst_54 = arith.constant dense<0.000000e+00> : vector<8x32xf32>
      %59 = tpu.matmul %56, %58, %cst_54 {dimension_numbers = #tpu.dot_dimension_numbers<[1], [0], [0], [1], [0, 0, 1, 1], [], []>} : vector<8x8xf32>, vector<8x32xf32>, vector<8x32xf32> -> vector<8x32xf32>
      %60 = arith.addf %54, %59 : vector<8x32xf32>
      %61 = vector.extract_strided_slice %49 {offsets = [2, 0, 0], sizes = [1, 8, 8], strides = [1, 1, 1]} : vector<4x8x8xf32> to vector<1x8x8xf32>
      %62 = vector.shape_cast %61 : vector<1x8x8xf32> to vector<8x8xf32>
      %c2 = arith.constant 2 : index
      %c0_55 = arith.constant 0 : index
      %c0_56 = arith.constant 0 : index
      %63 = vector.load %arg11[%c2, %c0_55, %c0_56] : memref<4x8x32xf32, #tpu.memory_space<vmem>>, vector<1x8x32xf32>
      %64 = vector.shape_cast %63 : vector<1x8x32xf32> to vector<8x32xf32>
      %cst_57 = arith.constant dense<0.000000e+00> : vector<8x32xf32>
      %65 = tpu.matmul %62, %64, %cst_57 {dimension_numbers = #tpu.dot_dimension_numbers<[1], [0], [0], [1], [0, 0, 1, 1], [], []>} : vector<8x8xf32>, vector<8x32xf32>, vector<8x32xf32> -> vector<8x32xf32>
      %66 = arith.addf %60, %65 : vector<8x32xf32>
      %67 = vector.extract_strided_slice %49 {offsets = [3, 0, 0], sizes = [1, 8, 8], strides = [1, 1, 1]} : vector<4x8x8xf32> to vector<1x8x8xf32>
      %68 = vector.shape_cast %67 : vector<1x8x8xf32> to vector<8x8xf32>
      %c3 = arith.constant 3 : index
      %c0_58 = arith.constant 0 : index
      %c0_59 = arith.constant 0 : index
      %69 = vector.load %arg11[%c3, %c0_58, %c0_59] : memref<4x8x32xf32, #tpu.memory_space<vmem>>, vector<1x8x32xf32>
      %70 = vector.shape_cast %69 : vector<1x8x32xf32> to vector<8x32xf32>
      %cst_60 = arith.constant dense<0.000000e+00> : vector<8x32xf32>
      %71 = tpu.matmul %68, %70, %cst_60 {dimension_numbers = #tpu.dot_dimension_numbers<[1], [0], [0], [1], [0, 0, 1, 1], [], []>} : vector<8x8xf32>, vector<8x32xf32>, vector<8x32xf32> -> vector<8x32xf32>
      %72 = arith.addf %66, %71 : vector<8x32xf32>
      %c0_61 = arith.constant 0 : index
      %c0_62 = arith.constant 0 : index
      %73 = vector.load %arg12[%c0_61, %c0_62] : memref<1x32xf32, #tpu.memory_space<vmem>>, vector<1x32xf32>
      %74 = vector.shape_cast %73 : vector<1x32xf32> to vector<32xf32>
      %75 = vector.shape_cast %74 : vector<32xf32> to vector<1x32xf32>
      %76 = vector.broadcast %75 : vector<1x32xf32> to vector<8x32xf32>
      %77 = arith.addf %72, %76 : vector<8x32xf32>
      %c0_63 = arith.constant 0 : index
      %c0_64 = arith.constant 0 : index
      %c0_65 = arith.constant 0 : index
      %78 = vector.load %arg13[%c0_63, %c0_64, %c0_65] : memref<1x8x32xf32, #tpu.memory_space<vmem>>, vector<1x8x32xf32>
      %79 = vector.shape_cast %78 : vector<1x8x32xf32> to vector<8x32xf32>
      %80 = vector.shape_cast %77 : vector<8x32xf32> to vector<1x8x32xf32>
      tpu.vector_store %arg13[%c0_63, %c0_64, %c0_65], %80 {strides = array<i32>} : memref<1x8x32xf32, #tpu.memory_space<vmem>>, vector<1x8x32xf32>,
    } else {
    }
    return
  }
  func.func @transform_0(%arg0: i32, %arg1: i32, %arg2: i32) -> (i32, i32, i32) {
    %c0_i32 = arith.constant 0 : i32
    %c0_i32_0 = arith.constant 0 : i32
    return %arg0, %arg1, %c0_i32 : i32, i32, i32
  }
  func.func @transform_1(%arg0: i32, %arg1: i32, %arg2: i32) -> (i32, i32, i32) {
    %c0_i32 = arith.constant 0 : i32
    %c0_i32_0 = arith.constant 0 : i32
    return %arg0, %arg2, %c0_i32 : i32, i32, i32
  }
  func.func @transform_2(%arg0: i32, %arg1: i32, %arg2: i32) -> (i32, i32, i32) {
    %c0_i32 = arith.constant 0 : i32
    %c0_i32_0 = arith.constant 0 : i32
    %c0_i32_1 = arith.constant 0 : i32
    %c0_i32_2 = arith.constant 0 : i32
    return %c0_i32, %c0_i32_0, %c0_i32_1 : i32, i32, i32
  }
  func.func @transform_3(%arg0: i32, %arg1: i32, %arg2: i32) -> (i32, i32, i32) {
    %c0_i32 = arith.constant 0 : i32
    %c0_i32_0 = arith.constant 0 : i32
    %c0_i32_1 = arith.constant 0 : i32
    %c0_i32_2 = arith.constant 0 : i32
    return %c0_i32, %c0_i32_0, %c0_i32_1 : i32, i32, i32
  }
  func.func @transform_4(%arg0: i32, %arg1: i32, %arg2: i32) -> (i32, i32, i32) {
    %c0_i32 = arith.constant 0 : i32
    %c0_i32_0 = arith.constant 0 : i32
    %c0_i32_1 = arith.constant 0 : i32
    %c0_i32_2 = arith.constant 0 : i32
    return %c0_i32, %c0_i32_0, %c0_i32_1 : i32, i32, i32
  }
  func.func @transform_5(%arg0: i32, %arg1: i32, %arg2: i32) -> (i32, i32, i32) {
    %c0_i32 = arith.constant 0 : i32
    %c0_i32_0 = arith.constant 0 : i32
    %c0_i32_1 = arith.constant 0 : i32
    %c0_i32_2 = arith.constant 0 : i32
    return %c0_i32, %c0_i32_0, %c0_i32_1 : i32, i32, i32
  }
  func.func @transform_6(%arg0: i32, %arg1: i32, %arg2: i32) -> (i32, i32, i32) {
    %c0_i32 = arith.constant 0 : i32
    %c0_i32_0 = arith.constant 0 : i32
    %c0_i32_1 = arith.constant 0 : i32
    %c0_i32_2 = arith.constant 0 : i32
    return %c0_i32, %c0_i32_0, %c0_i32_1 : i32, i32, i32
  }
  func.func @transform_7(%arg0: i32, %arg1: i32, %arg2: i32) -> (i32, i32, i32) {
    %c0_i32 = arith.constant 0 : i32
    %c0_i32_0 = arith.constant 0 : i32
    %c0_i32_1 = arith.constant 0 : i32
    %c0_i32_2 = arith.constant 0 : i32
    return %c0_i32, %c0_i32_0, %c0_i32_1 : i32, i32, i32
  }
  func.func @transform_8(%arg0: i32, %arg1: i32, %arg2: i32) -> (i32, i32, i32) {
    %c0_i32 = arith.constant 0 : i32
    %c0_i32_0 = arith.constant 0 : i32
    %c0_i32_1 = arith.constant 0 : i32
    %c0_i32_2 = arith.constant 0 : i32
    return %c0_i32, %c0_i32_0, %c0_i32_1 : i32, i32, i32
  }
  func.func @transform_9(%arg0: i32, %arg1: i32, %arg2: i32) -> (i32, i32) {
    %c0_i32 = arith.constant 0 : i32
    %c0_i32_0 = arith.constant 0 : i32
    %c0_i32_1 = arith.constant 0 : i32
    return %c0_i32, %c0_i32_0 : i32, i32
  }
  func.func @transform_10(%arg0: i32, %arg1: i32, %arg2: i32) -> (i32, i32, i32) {
    %c0_i32 = arith.constant 0 : i32
    %c0_i32_0 = arith.constant 0 : i32
    return %arg0, %arg1, %c0_i32 : i32, i32, i32
  }
}

</mosaic_0001>

<bundles_post_ra>
// kernel: tpu_custom_call.1
= control target key start
LH: loop header
LB: loop body
LE: loop exit
PB: predicated region body
PF: predicated region fallthrough
CT: control target
= control target key end

     0   :  { %s3811_s0 = inlined_call_operand.vmem [shape: f32[2,16,32], index: 0, kind: input, shape index: {}]   ;;  %s3812_s1 = inlined_call_operand.vmem [shape: f32[2,16,32], index: 1, kind: input, shape index: {}]   ;;  %s3813_s2 = inlined_call_operand.vmem [shape: f32[4,32,8], index: 2, kind: input, shape index: {}]   ;;  %s3814_s3 = inlined_call_operand.vmem [shape: f32[4,32,8], index: 3, kind: input, shape index: {}]   ;;  %s3815_s4 = inlined_call_operand.vmem [shape: f32[4,32,8], index: 4, kind: input, shape index: {}]   ;;  %s3816_s5 = inlined_call_operand.vmem [shape: f32[4,1,8], index: 5, kind: input, shape index: {}]   ;;  %s3817_s6 = inlined_call_operand.vmem [shape: f32[4,1,8], index: 6, kind: input, shape index: {}]   ;;  %s3818_s7 = inlined_call_operand.vmem [shape: f32[4,1,8], index: 7, kind: input, shape index: {}]   ;;  %s3819_s8 = inlined_call_operand.vmem [shape: f32[4,8,32], index: 8, kind: input, shape index: {}]   ;;  %s3820_s9 = inlined_call_operand.vmem [shape: f32[1,32], index: 9, kind: input, shape index: {}]   ;;  %s3821_s10 = inlined_call_operand.hbm [shape: f32[2,16,32], index: 10, kind: output, shape index: {}]  }
   0x1   :  { %3834 = sst [smem:[#allocation20_spill]] %s3821_s10 }
   0x2   :  { %15 = vsyncpa [#allocation7], 0 }
   0x3   :  { %17 = vsyncpa [#allocation7 + $0x1], 0  ;;  %s3267_s13 = smov 0   ;;  %s3269_s14 = smov 0  }
   0x4   :  { %s3271_s15 = smov 0   ;;  %s3273_s16 = smov 0  }
   0x5   :  { %s3275_s17 = smov 0   ;;  %s3277_s18 = smov 0  }
   0x6   :  { %s3279_s19 = smov 0   ;;  %s3281_s20 = smov 0  }
   0x7   :  { %s3283_s21 = smov 0   ;;  %s3285_s22 = smov 0  }
   0x8 LB: > { %3835 = sst [smem:[#allocation9_spill]] %s3164_s13  ;;  %s2631_s23 = sadd.s32 4294967295, %s3200_s22   ;;  %s3200_s22 = sphi %s3285_s22, %s23_s22   ;;  %s3196_s21 = sphi %s3283_s21, %s3863_s21   ;;  %s3192_s20 = sphi %s3281_s20, %s3859_s20   ;;  %s3188_s19 = sphi %s3279_s19, %s3858_s19   ;;  %s3184_s18 = sphi %s3277_s18, %s3857_s18   ;;  %s3180_s17 = sphi %s3275_s17, %s3856_s17   ;;  %s3176_s16 = sphi %s3273_s16, %s3855_s16   ;;  %s3172_s15 = sphi %s3271_s15, %s3854_s15   ;;  %s3168_s14 = sphi %s3269_s14, %s3862_s14   ;;  %s3164_s13 = sphi %s3267_s13, %s3861_s13  }
   0x9   : > { %3836 = sst [smem:[#allocation10_spill]] %s3172_s15  ;;  %s2632_s24 = sadd.s32 4294967294, %s3200_s22  }
   0xa   : > { %3837 = sst [smem:[#allocation11_spill]] %s3188_s19  ;;  %s35_s25 = sadd.s32 1, %s3188_s19 }
   0xb   : > { %3838 = sst [smem:[#allocation12_spill]] %s3192_s20  ;;  %p36_p0 = scmp.ge.s32.totalorder %s35_s25, 2 }
   0xc   : > { %3839 = sst [smem:[#allocation13_spill]] %s3196_s21  ;;  %s38_s26 = sadd.s32 1, %s3192_s20 }
   0xd   : > { %3840 = sst [smem:[#allocation14_spill]] %s3200_s22  ;;  %s42_s27 = sadd.s32 1, %s3196_s21 }
   0xe   : > { %p285_p1 = scmp.ne.s32.totalorder %s3172_s15, %s3168_s14  ;;  %s3865_s25 = smov (%p36_p0, %s35_s25), 0 }
   0xf   : > { %3841 = sst [smem:[#allocation15_spill]] %s3865_s25  ;;  %s3867_s26 = smov (!%p36_p0, %s38_s26), %s3192_s20 }
  0x10   : > { %p286_p2 = scmp.eq.s32.totalorder %s2631_s23, 7  ;;  %p291_p3 = scmp.ne.s32.totalorder %s3168_s14, %s3164_s13 }
  0x11   : > { %p40_p4 = scmp.ge.s32.totalorder %s3867_s26, 2  ;;  %p292_p5 = scmp.eq.s32.totalorder %s2632_s24, 7 }
  0x12   : > { %p3329_p6 = por %p286_p2, %p285_p1  ;;  %p2635_p8 = scmp.ge.s32.totalorder %s3200_s22, 1 }
  0x13   : > { %s3869_s26 = smov (%p40_p4, %s3867_s26), 0  ;;  %s3871_s27 = smov (!%p40_p4, %s42_s27), %s3196_s21 }
  0x14   : > { %3843 = sst [smem:[#allocation16_spill]] %s3869_s26  ;;  %p3336_p7 = por %p292_p5, %p291_p3 }
  0x15   : > { %p44_p9 = scmp.ge.s32.totalorder %s3871_s27, 2  ;;  %p356_p10 = scmp.lt.s32.totalorder %s3200_s22, 9 }
  0x16   : > { %s3844_s29 = scalar_select %p3336_p7, 1, 0 }
  0x17   : > { %s271_s30 = ssub.s32 %s3192_s20, %s3869_s26  ;;  %s3873_s27 = smov (%p44_p9, %s3871_s27), 0 }
  0x18   : > { %3845 = sst [smem:[#allocation17_spill]] %s3844_s29  ;;  %p357_p11 = pnand %p2635_p8, %p356_p10 }
  0x19   : > { %3846 = sst [smem:[#allocation18_spill]] %s3873_s27  ;;  %s270_s11 = ssub.s32 %s3196_s21, %s3873_s27 }
  0x1a   : > { %s272_s12 = sor.u32 %s271_s30, %s270_s11  ;;  %s275_s23 = sadd.s32 1, %s3172_s15 }
  0x1b   : > { %p273_p12 = scmp.eq.s32.totalorder %s272_s12, 0  ;;  %360 = sbr.rel (%p357_p11) target bundleno = 1528 (0x5f8), region = 60 }
  0x1c   : > { %s3832_s26 = sand.u32 (!%p357_p11), 1, %s3168_s14   ;;  %p405_p13 = scmp.lt.s32.totalorder (!%p357_p11), %s3184_s18, 1 }
  0x1d   : > { %s3350_s24 = scalar_select %p273_p12, %s3172_s15, %s275_s23  }
  0x1e   : > { %s3356_s25 = sshll.u32 (!%p357_p11), %s3832_s26, 3  ;;  %p407_p0 = scmp.lt.s32.totalorder (!%p357_p11), %s3180_s17, 1 }
  0x1f   : > { %3847 = sst [smem:[#allocation19_spill]] %s3350_s24  ;;  %p415_p1 = scmp.lt.s32.totalorder (!%p357_p11), %s3176_s16, 1 }
  0x20   : > { %s406_s30 = scalar_select %p405_p13, %s3184_s18, 1 }
  0x21   : > { %s408_s11 = scalar_select %p407_p0, %s3180_s17, 1 }
  0x22   : > { %s2637_s12 = sshll.u32 %s406_s30, 1  ;;  %s404_s10 = scalar_lea.vmem [#allocation6], %s3356_s25 }
  0x23   : > { %s410_s23 = sadd.s32 %s2637_s12, %s408_s11  ;;  %p2641_p2 = scmp.ne.s32.totalorder %s3176_s16, 0 }
  0x24   : > { %s2638_s27 = sshll.u32 %s410_s23, 3 }
  0x25   : > { %s3365_s19 = scalar_lea.vmem %s3811_s0, %s2638_s27 }
  0x26   : > { %s416_s24 = scalar_select %p415_p1, %s3176_s16, 1 }
  0x27   : > { %424 = sbr.rel (%p2641_p2) target bundleno = 262 (0x106), region = 64 }
  0x28   : > { %s418_s15 = sadd.s32 %s2637_s12, %s416_s24 }
  0x29   : > { %s2640_s29 = sshll.u32 %s418_s15, 3 }
  0x2a   : > { %s3371_s26 = scalar_lea.vmem %s3812_s1, %s2640_s29 }
  0x2c   : > { %vm763_vm0 = vcmask 7168   ;;  %v429_v0 = vld [vmem:[%s3813_s2 + $0x18] sm:$0xff]  ;;  %v3202_v2 = vmov 0.0   ;;  %v3203_v3 = vmov -inf   ;;  %v428_v4 = vld [vmem:[%s3813_s2 + $0x10] sm:$0xff]  ;;  %v427_v6 = vld [vmem:[%s3813_s2 + $0x8] sm:$0xff] }
  0x2d   : > { %v433_v1 = vld [vmem:[%s3813_s2 + $0x38] sm:$0xff]  ;;  %2776 = vmatprep.subr.mxu0 %v3202_v2  ;;  %764 = vst.msk [vmem:[#allocation3] sm:$0xff] %vm763_vm0, %v3203_v3  ;;  %765 = vst.msk [vmem:[#allocation3 + $0x8] sm:$0xff] %vm763_vm0, %v3203_v3  ;;  %2787 = vmatprep.subr.mxu1 %v3202_v2  ;;  %v432_v5 = vld [vmem:[%s3813_s2 + $0x30] sm:$0xff]  ;;  %vm470_vm1 = vcmask 261120   ;;  %vm3204_vm2 = vmmov 0  }
  0x2e   : > { %766 = vst.msk [vmem:[#allocation3 + $0x10] sm:$0xff] %vm763_vm0, %v3203_v3  ;;  %767 = vst.msk [vmem:[#allocation3 + $0x18] sm:$0xff] %vm763_vm0, %v3203_v3  ;;  %2777 = vmatpush3.msra.mxu0 %v429_v0  ;;  %2788 = vmatpush3.msra.mxu1 %v433_v1  ;;  %v431_v7 = vld [vmem:[%s3813_s2 + $0x28] sm:$0xff]  ;;  %v426_v8 = vld [vmem:[%s3813_s2] sm:$0xff]  ;;  %vm758_vm3 = vcmask 64512  }
  0x2f   : > { %768 = vst.msk [vmem:[#allocation4] sm:$0xff] %vm763_vm0, %v3202_v2  ;;  %769 = vst.msk [vmem:[#allocation4 + $0x8] sm:$0xff] %vm763_vm0, %v3202_v2  ;;  %2778 = vmatprep.subr.mxu0 %v3202_v2  ;;  %2789 = vmatprep.subr.mxu1 %v3202_v2  ;;  %v430_v9 = vld [vmem:[%s3813_s2 + $0x20] sm:$0xff]  ;;  %v437_v11 = vld [vmem:[%s3813_s2 + $0x58] sm:$0xff] }
  0x30   : > { %770 = vst.msk [vmem:[#allocation4 + $0x10] sm:$0xff] %vm763_vm0, %v3202_v2  ;;  %771 = vst.msk [vmem:[#allocation4 + $0x18] sm:$0xff] %vm763_vm0, %v3202_v2  ;;  %2779 = vmatpush3.msra.mxu0 %v428_v4  ;;  %2790 = vmatpush3.msra.mxu1 %v432_v5  ;;  %v425_v10 = vld [vmem:[%s3365_s19] sm:$0xff]  ;;  %v441_v12 = vld [vmem:[%s3813_s2 + $0x78] sm:$0xff] }
  0x31   : > { %2780 = vmatprep.subr.mxu0 %v3202_v2  ;;  %2791 = vmatprep.subr.mxu1 %v3202_v2  ;;  %v436_v13 = vld [vmem:[%s3813_s2 + $0x50] sm:$0xff]  ;;  %v435_v15 = vld [vmem:[%s3813_s2 + $0x48] sm:$0xff]  ;;  %v434_v17 = vld [vmem:[%s3813_s2 + $0x40] sm:$0xff]  ;;  %772 = vst.msk [vmem:[#allocation5] sm:$0xff] %vm758_vm3, %v3202_v2 }
  0x32   : > { %2781 = vmatpush3.msra.mxu0 %v427_v6  ;;  %2792 = vmatpush3.msra.mxu1 %v431_v7  ;;  %v440_v14 = vld [vmem:[%s3813_s2 + $0x70] sm:$0xff]  ;;  %v439_v16 = vld [vmem:[%s3813_s2 + $0x68] sm:$0xff]  ;;  %v438_v18 = vld [vmem:[%s3813_s2 + $0x60] sm:$0xff]  ;;  %773 = vst.msk [vmem:[#allocation5 + $0x8] sm:$0xff] %vm758_vm3, %v3202_v2 }
  0x33   : > { %2782 = vmatprep.subr.mxu0 %v3202_v2  ;;  %2793 = vmatprep.subr.mxu1 %v3202_v2  ;;  %774 = vst.msk [vmem:[#allocation5 + $0x10] sm:$0xff] %vm758_vm3, %v3202_v2  ;;  %775 = vst.msk [vmem:[#allocation5 + $0x18] sm:$0xff] %vm758_vm3, %v3202_v2  ;;  %v2642_v19 = vld [vmem:[%s3816_s5] ss:$0 sm:$0xff]  ;;  %v2643_v20 = vld [vmem:[%s3816_s5 + $0x1] ss:$0 sm:$0xff] }
  0x34   : > { %2783 = vmatpush3.msra.mxu0 %v426_v8  ;;  %2784 = vmatprep.mubr.msk.f32.mxu0 %vm3204_vm2, %v3202_v2  ;;  %v2644_v29 = vld [vmem:[%s3816_s5 + $0x2] ss:$0 sm:$0xff]  ;;  %v2645_v30 = vld [vmem:[%s3816_s5 + $0x3] ss:$0 sm:$0xff] }
  0x35   : > { %2794 = vmatpush3.msra.mxu1 %v430_v9  ;;  %2795 = vmatprep.mubr.msk.f32.mxu1 %vm3204_vm2, %v3202_v2 }
  0x36   : > { %2785 = vmatmul.mubr.msk.f32.vlgmr.msra.gmra.mxu0 %vm470_vm1, %v425_v10  ;;  %2796 = vmatmul.mubr.msk.f32.vlgmr.msra.gmra.mxu1 %vm470_vm1, %v425_v10 }
  0x37   : > { %2798 = vmatprep.subr.mxu0 %v3202_v2  ;;  %2809 = vmatprep.subr.mxu1 %v3202_v2 }
  0x38   : > { %2799 = vmatpush3.msra.mxu0 %v437_v11  ;;  %2810 = vmatpush3.msra.mxu1 %v441_v12 }
  0x39   : > { %2800 = vmatprep.subr.mxu0 %v3202_v2  ;;  %2811 = vmatprep.subr.mxu1 %v3202_v2 }
  0x3a   : > { %2801 = vmatpush3.msra.mxu0 %v436_v13  ;;  %2812 = vmatpush3.msra.mxu1 %v440_v14 }
  0x3b   : > { %2802 = vmatprep.subr.mxu0 %v3202_v2  ;;  %2813 = vmatprep.subr.mxu1 %v3202_v2 }
  0x3c   : > { %2803 = vmatpush3.msra.mxu0 %v435_v15  ;;  %2814 = vmatpush3.msra.mxu1 %v439_v16 }
  0x3d   : > { %2804 = vmatprep.subr.mxu0 %v3202_v2  ;;  %2815 = vmatprep.subr.mxu1 %v3202_v2 }
  0x3e   : > { %2805 = vmatpush3.msra.mxu0 %v434_v17  ;;  %2806 = vmatprep.mubr.msk.f32.mxu0 %vm3204_vm2, %v3202_v2 }
  0x3f   : > { %2816 = vmatpush3.msra.mxu1 %v438_v18  ;;  %2817 = vmatprep.mubr.msk.f32.mxu1 %vm3204_vm2, %v3202_v2 }
  0x40   : > { %2807 = vmatmul.mubr.msk.f32.vlgmr.msra.gmra.mxu0 %vm470_vm1, %v425_v10  ;;  %2818 = vmatmul.mubr.msk.f32.vlgmr.msra.gmra.mxu1 %vm470_vm1, %v425_v10 }
  0xf6   : > { %v540_v21 = vpop.f32.mrf.mxu0  ;;  %v610_v22 = vpop.f32.mrf.mxu1 }
  0xf7   : > { %v541_v23 = vadd.f32 %v2642_v19, %v540_v21  ;;  %v611_v24 = vadd.f32 %v2643_v20, %v610_v22 }
  0xf8   : > { %v2786_v25 = vpop.f32.mrf.mxu0  ;;  %v2797_v26 = vpop.f32.mrf.mxu1 }
  0xf9   : > { %v754_v27 = vmul.f32 0.35355338, %v541_v23  ;;  %v755_v28 = vmul.f32 0.35355338, %v611_v24 }
  0xfb   : > { %759 = vst.msk [vmem:[#allocation2] sm:$0xff] %vm758_vm3, %v754_v27  ;;  %760 = vst.msk [vmem:[#allocation2 + $0x8] sm:$0xff] %vm758_vm3, %v755_v28 }
 0x100   : > { %v680_v31 = vpop.f32.mrf.mxu0  ;;  %v750_v32 = vpop.f32.mrf.mxu1 }
 0x101   : > { %v681_v33 = vadd.f32 %v2644_v29, %v680_v31  ;;  %v751_v34 = vadd.f32 %v2645_v30, %v750_v32 }
 0x102   : > { %v2808_v35 = vpop.f32.mrf.mxu0  ;;  %v2819_v36 = vpop.f32.mrf.mxu1 }
 0x103   : > { %v756_v37 = vmul.f32 0.35355338, %v681_v33  ;;  %v757_v38 = vmul.f32 0.35355338, %v751_v34 }
 0x105   : > { %761 = vst.msk [vmem:[#allocation2 + $0x10] sm:$0xff] %vm758_vm3, %v756_v37  ;;  %762 = vst.msk [vmem:[#allocation2 + $0x18] sm:$0xff] %vm758_vm3, %v757_v38 }
 0x106 PF: > { %v780_v39 = vld [vmem:[%s3814_s3 + $0x18] sm:$0xff]  ;;  %v3205_v41 = vmov 0.0   ;;  %v779_v42 = vld [vmem:[%s3814_s3 + $0x10] sm:$0xff]  ;;  %v778_v44 = vld [vmem:[%s3814_s3 + $0x8] sm:$0xff]  ;;  %vm3206_vm4 = vmmov 0   ;;  %vm821_vm5 = vcmask 261120  }
 0x107   : > { %v784_v40 = vld [vmem:[%s3814_s3 + $0x38] sm:$0xff]  ;;  %2820 = vmatprep.subr.mxu0 %v3205_v41  ;;  %2831 = vmatprep.subr.mxu1 %v3205_v41  ;;  %v783_v43 = vld [vmem:[%s3814_s3 + $0x30] sm:$0xff]  ;;  %v782_v45 = vld [vmem:[%s3814_s3 + $0x28] sm:$0xff]  ;;  %vm1433_vm6 = vcmask 64512   ;;  %vm1826_vm7 = vcmask 7168   ;;  %p2678_p3 = scmp.ne.s32.totalorder %s3176_s16, 1 }
 0x108   : > { %2821 = vmatpush3.msra.mxu0 %v780_v39  ;;  %2832 = vmatpush3.msra.mxu1 %v784_v40  ;;  %v777_v46 = vld [vmem:[%s3814_s3] sm:$0xff]  ;;  %v788_v49 = vld [vmem:[%s3814_s3 + $0x58] sm:$0xff]  ;;  %v787_v50 = vld [vmem:[%s3814_s3 + $0x50] sm:$0xff] }
 0x109   : > { %2822 = vmatprep.subr.mxu0 %v3205_v41  ;;  %2833 = vmatprep.subr.mxu1 %v3205_v41  ;;  %v3510_v47 = vld [vmem:[%s3371_s26] sm:$0xff]  ;;  %v792_v51 = vld [vmem:[%s3814_s3 + $0x78] sm:$0xff]  ;;  %v786_v52 = vld [vmem:[%s3814_s3 + $0x48] sm:$0xff] }
 0x10a   : > { %2823 = vmatpush3.msra.mxu0 %v779_v42  ;;  %2834 = vmatpush3.msra.mxu1 %v783_v43  ;;  %v781_v48 = vld [vmem:[%s3814_s3 + $0x20] sm:$0xff]  ;;  %v791_v53 = vld [vmem:[%s3814_s3 + $0x70] sm:$0xff]  ;;  %v790_v55 = vld [vmem:[%s3814_s3 + $0x68] sm:$0xff] }
 0x10b   : > { %2824 = vmatprep.subr.mxu0 %v3205_v41  ;;  %2835 = vmatprep.subr.mxu1 %v3205_v41  ;;  %v785_v54 = vld [vmem:[%s3814_s3 + $0x40] sm:$0xff]  ;;  %v1108_v57 = vld [vmem:[%s3815_s4 + $0x18] sm:$0xff]  ;;  %v1107_v58 = vld [vmem:[%s3815_s4 + $0x10] sm:$0xff] }
 0x10c   : > { %2825 = vmatpush3.msra.mxu0 %v778_v44  ;;  %2828 = vmatprep.mubr.msk.f32.mxu0 %vm3206_vm4, %v3205_v41  ;;  %v789_v56 = vld [vmem:[%s3814_s3 + $0x60] sm:$0xff]  ;;  %v1112_v59 = vld [vmem:[%s3815_s4 + $0x38] sm:$0xff]  ;;  %v1106_v60 = vld [vmem:[%s3815_s4 + $0x8] sm:$0xff] }
 0x10d   : > { %2826 = vmatprep.subr.mxu0 %v3205_v41  ;;  %2836 = vmatpush3.msra.mxu1 %v782_v45  ;;  %v1111_v61 = vld [vmem:[%s3815_s4 + $0x30] sm:$0xff]  ;;  %v1105_v62 = vld [vmem:[%s3815_s4] sm:$0xff]  ;;  %v1110_v63 = vld [vmem:[%s3815_s4 + $0x28] sm:$0xff] }
 0x10e   : > { %2827 = vmatpush3.msra.mxu0 %v777_v46  ;;  %2837 = vmatprep.subr.mxu1 %v3205_v41  ;;  %v1116_v0 = vld [vmem:[%s3815_s4 + $0x58] sm:$0xff]  ;;  %v1109_v1 = vld [vmem:[%s3815_s4 + $0x20] sm:$0xff]  ;;  %v1115_v2 = vld [vmem:[%s3815_s4 + $0x50] sm:$0xff] }
 0x10f   : > { %2829 = vmatmul.mubr.msk.f32.vlgmr.msra.gmra.mxu0 %vm821_vm5, %v3510_v47  ;;  %2842 = vmatprep.subr.mxu0 %v3205_v41  ;;  %v1114_v3 = vld [vmem:[%s3815_s4 + $0x48] sm:$0xff]  ;;  %v1120_v4 = vld [vmem:[%s3815_s4 + $0x78] sm:$0xff]  ;;  %v1113_v5 = vld [vmem:[%s3815_s4 + $0x40] sm:$0xff] }
 0x110   : > { %2838 = vmatpush3.msra.mxu1 %v781_v48  ;;  %2839 = vmatprep.mubr.msk.f32.mxu1 %vm3206_vm4, %v3205_v41  ;;  %v1119_v6 = vld [vmem:[%s3815_s4 + $0x70] sm:$0xff]  ;;  %v1118_v7 = vld [vmem:[%s3815_s4 + $0x68] sm:$0xff]  ;;  %v1117_v8 = vld [vmem:[%s3815_s4 + $0x60] sm:$0xff] }
 0x111   : > { %2843 = vmatpush3.msra.mxu0 %v788_v49  ;;  %2840 = vmatmul.mubr.msk.f32.vlgmr.msra.gmra.mxu1 %vm821_vm5, %v3510_v47  ;;  %v2650_v9 = vld [vmem:[%s3817_s6] ss:$0 sm:$0xff]  ;;  %v2651_v11 = vld [vmem:[%s3817_s6 + $0x1] ss:$0 sm:$0xff]  ;;  %v1430_v18 = vld [vmem:[#allocation2 + $0x8] sm:$0xff] }
 0x112   : > { %2844 = vmatprep.subr.mxu0 %v3205_v41  ;;  %2853 = vmatprep.subr.mxu1 %v3205_v41  ;;  %v1429_v16 = vld [vmem:[#allocation2] sm:$0xff]  ;;  %v1431_v25 = vld [vmem:[#allocation2 + $0x10] sm:$0xff]  ;;  %v1432_v28 = vld [vmem:[#allocation2 + $0x18] sm:$0xff] }
 0x113   : > { %2845 = vmatpush3.msra.mxu0 %v787_v50  ;;  %2854 = vmatpush3.msra.mxu1 %v792_v51  ;;  %v2652_v19 = vld [vmem:[%s3817_s6 + $0x2] ss:$0 sm:$0xff]  ;;  %v2653_v22 = vld [vmem:[%s3817_s6 + $0x3] ss:$0 sm:$0xff]  ;;  %v2658_v29 = vld [vmem:[%s3818_s7] ss:$0 sm:$0xff] }
 0x114   : > { %2846 = vmatprep.subr.mxu0 %v3205_v41  ;;  %2855 = vmatprep.subr.mxu1 %v3205_v41  ;;  %v2659_v33 = vld [vmem:[%s3818_s7 + $0x1] ss:$0 sm:$0xff] }
 0x115   : > { %2847 = vmatpush3.msra.mxu0 %v786_v52  ;;  %2856 = vmatpush3.msra.mxu1 %v791_v53 }
 0x116   : > { %2848 = vmatprep.subr.mxu0 %v3205_v41  ;;  %2857 = vmatprep.subr.mxu1 %v3205_v41 }
 0x117   : > { %2849 = vmatpush3.msra.mxu0 %v785_v54  ;;  %2850 = vmatprep.mubr.msk.f32.mxu0 %vm3206_vm4, %v3205_v41  ;;  %v3207_v54 = vmov 0  }
 0x118   : > { %2858 = vmatpush3.msra.mxu1 %v790_v55  ;;  %2851 = vmatmul.mubr.msk.f32.vlgmr.msra.gmra.mxu0 %vm821_vm5, %v3510_v47  ;;  %v1738_v55 = vld [vmem:[#allocation3] sm:$0xff] }
 0x119   : > { %2859 = vmatprep.subr.mxu1 %v3205_v41  ;;  %2861 = vmatprep.mubr.msk.f32.mxu1 %vm3206_vm4, %v3205_v41 }
 0x11a   : > { %2860 = vmatpush3.msra.mxu1 %v789_v56  ;;  %2864 = vmatprep.subr.mxu0 %v3205_v41 }
 0x11b   : > { %2862 = vmatmul.mubr.msk.f32.vlgmr.msra.gmra.mxu1 %vm821_vm5, %v3510_v47  ;;  %2865 = vmatpush3.msra.mxu0 %v1108_v57 }
 0x11c   : > { %2866 = vmatprep.subr.mxu0 %v3205_v41  ;;  %2875 = vmatprep.subr.mxu1 %v3205_v41 }
 0x11d   : > { %2867 = vmatpush3.msra.mxu0 %v1107_v58  ;;  %2876 = vmatpush3.msra.mxu1 %v1112_v59  ;;  %v1739_v58 = vld [vmem:[#allocation3 + $0x8] sm:$0xff] }
 0x11e   : > { %2868 = vmatprep.subr.mxu0 %v3205_v41  ;;  %2877 = vmatprep.subr.mxu1 %v3205_v41 }
 0x11f   : > { %2869 = vmatpush3.msra.mxu0 %v1106_v60  ;;  %2872 = vmatprep.mubr.msk.f32.mxu0 %vm3206_vm4, %v3205_v41 }
 0x120   : > { %2870 = vmatprep.subr.mxu0 %v3205_v41  ;;  %2878 = vmatpush3.msra.mxu1 %v1111_v61 }
 0x121   : > { %2871 = vmatpush3.msra.mxu0 %v1105_v62  ;;  %2879 = vmatprep.subr.mxu1 %v3205_v41 }
 0x122   : > { %2873 = vmatmul.mubr.msk.f32.vlgmr.msra.gmra.mxu0 %vm821_vm5, %v3510_v47  ;;  %2886 = vmatprep.subr.mxu0 %v3205_v41 }
 0x123   : > { %2880 = vmatpush3.msra.mxu1 %v1110_v63  ;;  %2887 = vmatpush3.msra.mxu0 %v1116_v0  ;;  %v1740_v0 = vld [vmem:[#allocation3 + $0x10] sm:$0xff] }
 0x124   : > { %2881 = vmatprep.subr.mxu1 %v3205_v41  ;;  %2888 = vmatprep.subr.mxu0 %v3205_v41 }
 0x125   : > { %2882 = vmatpush3.msra.mxu1 %v1109_v1  ;;  %2883 = vmatprep.mubr.msk.f32.mxu1 %vm3206_vm4, %v3205_v41 }
 0x126   : > { %2889 = vmatpush3.msra.mxu0 %v1115_v2  ;;  %2884 = vmatmul.mubr.msk.f32.vlgmr.msra.gmra.mxu1 %vm821_vm5, %v3510_v47 }
 0x127   : > { %2890 = vmatprep.subr.mxu0 %v3205_v41  ;;  %2897 = vmatprep.subr.mxu1 %v3205_v41 }
 0x128   : > { %2891 = vmatpush3.msra.mxu0 %v1114_v3  ;;  %2898 = vmatpush3.msra.mxu1 %v1120_v4  ;;  %v1741_v3 = vld [vmem:[#allocation3 + $0x18] sm:$0xff] }
 0x129   : > { %2892 = vmatprep.subr.mxu0 %v3205_v41  ;;  %2899 = vmatprep.subr.mxu1 %v3205_v41 }
 0x12a   : > { %2894 = vmatprep.mubr.msk.f32.mxu0 %vm3206_vm4, %v3205_v41  ;;  %2905 = vmatprep.mubr.msk.f32.mxu1 %vm3206_vm4, %v3205_v41 }
 0x12b   : > { %2893 = vmatpush3.msra.mxu0 %v1113_v5  ;;  %2900 = vmatpush3.msra.mxu1 %v1119_v6 }
 0x12c   : > { %2895 = vmatmul.mubr.msk.f32.vlgmr.msra.gmra.mxu0 %vm821_vm5, %v3510_v47  ;;  %2901 = vmatprep.subr.mxu1 %v3205_v41 }
 0x12d   : > { %2902 = vmatpush3.msra.mxu1 %v1118_v7  ;;  %2908 = vmatprep.subr.mxu0 %v3205_v41 }
 0x12e   : > { %2903 = vmatprep.subr.mxu1 %v3205_v41  ;;  %2910 = vmatprep.mubr.msk.f32.mxu0 %vm3206_vm4, %v3205_v41 }
 0x12f   : > { %2904 = vmatpush3.msra.mxu1 %v1117_v8  ;;  %3064 = vset.pattern.permute.xlu0 %v3207_v54 }
 0x130   : > { %2906 = vmatmul.mubr.msk.f32.vlgmr.msra.gmra.mxu1 %vm821_vm5, %v3510_v47  ;;  %2913 = vmatprep.subr.mxu1 %v3205_v41 }
 0x131   : > { %2915 = vmatprep.mubr.msk.f32.mxu1 %vm3206_vm4, %v3205_v41  ;;  %3065 = vset.pattern.permute.xlu1 %v3207_v54  ;;  %v1805_v54 = vld [vmem:[#allocation4 + $0x18] sm:$0xff] }
 0x1cf   : > { %v891_v10 = vpop.f32.mrf.mxu0 }
 0x1d0   : > { %v892_v12 = vadd.f32 %v2650_v9, %v891_v10 }
 0x1d1   : > { %v2830_v13 = vpop.f32.mrf.mxu0  ;;  %v961_v14 = vpop.f32.mrf.mxu1 }
 0x1d2   : > { %v962_v15 = vadd.f32 %v2651_v11, %v961_v14  ;;  %2909 = vmatpush3.xpose.msk.msra.mxu0 %vm1433_vm6, %v892_v12 }
 0x1d3   : > { %v2841_v17 = vpop.f32.mrf.mxu1  ;;  %2918 = vmatprep.subr.mxu0 %v3205_v41 }
 0x1d4   : > { %2914 = vmatpush3.xpose.msk.msra.mxu1 %vm1433_vm6, %v962_v15 }
 0x1d5   : > { %2911 = vmatmul.mubr.msk.f32.vlgmr.msra.gmra.mxu0 %vm1433_vm6, %v1429_v16  ;;  %2923 = vmatprep.subr.mxu1 %v3205_v41 }
 0x1d6   : > { %2920 = vmatprep.mubr.msk.f32.mxu0 %vm3206_vm4, %v3205_v41 }
 0x1d7   : > { %2916 = vmatmul.mubr.msk.f32.vlgmr.msra.gmra.mxu1 %vm1433_vm6, %v1430_v18 }
 0x1d8   : > { %v1031_v20 = vpop.f32.mrf.mxu0  ;;  %2925 = vmatprep.mubr.msk.f32.mxu1 %vm3206_vm4, %v3205_v41 }
 0x1d9   : > { %v1032_v21 = vadd.f32 %v2652_v19, %v1031_v20  ;;  %v2660_v20 = vld [vmem:[%s3818_s7 + $0x2] ss:$0 sm:$0xff] }
 0x1da   : > { %v2852_v23 = vpop.f32.mrf.mxu0 }
 0x1db   : > { %v1101_v24 = vpop.f32.mrf.mxu1  ;;  %2919 = vmatpush3.xpose.msk.msra.mxu0 %vm1433_vm6, %v1032_v21 }
 0x1dc   : > { %v1102_v26 = vadd.f32 %v2653_v22, %v1101_v24  ;;  %2928 = vmatprep.subr.mxu0 %v3205_v41  ;;  %v2661_v24 = vld [vmem:[%s3818_s7 + $0x3] ss:$0 sm:$0xff] }
 0x1dd   : > { %v2863_v27 = vpop.f32.mrf.mxu1 }
 0x1de   : > { %2921 = vmatmul.mubr.msk.f32.vlgmr.msra.gmra.mxu0 %vm1433_vm6, %v1431_v25  ;;  %2924 = vmatpush3.xpose.msk.msra.mxu1 %vm1433_vm6, %v1102_v26 }
 0x1df   : > { %2933 = vmatprep.subr.mxu1 %v3205_v41  ;;  %2930 = vmatprep.mubr.msk.f32.mxu0 %vm3206_vm4, %v3205_v41 }
 0x1e1   : > { %2926 = vmatmul.mubr.msk.f32.vlgmr.msra.gmra.mxu1 %vm1433_vm6, %v1432_v28 }
 0x1e2   : > { %v1215_v30 = vpop.f32.mrf.mxu0  ;;  %2935 = vmatprep.mubr.msk.f32.mxu1 %vm3206_vm4, %v3205_v41 }
 0x1e3   : > { %v1216_v31 = vadd.f32 %v2658_v29, %v1215_v30 }
 0x1e4   : > { %v2874_v32 = vpop.f32.mrf.mxu0 }
 0x1e5   : > { %2929 = vmatpush3.msra.mxu0 %v1216_v31 }
 0x1e6   : > { %v1285_v34 = vpop.f32.mrf.mxu1  ;;  %2938 = vmatprep.subr.mxu0 %v3205_v41 }
 0x1e7   : > { %v1286_v35 = vadd.f32 %v2659_v33, %v1285_v34 }
 0x1e8   : > { %v2885_v36 = vpop.f32.mrf.mxu1 }
 0x1e9   : > { %2934 = vmatpush3.msra.mxu1 %v1286_v35 }
 0x1ea   : > { %2943 = vmatprep.subr.mxu1 %v3205_v41 }
 0x1ec   : > { %v3689_v37 = vpop.f32.mrf.mxu0 }
 0x1ed   : > { %v1356_v23 = vadd.f32 %v2660_v20, %v3689_v37 }
 0x1ee   : > { %v2896_v38 = vpop.f32.mrf.mxu0 }
 0x1f0   : > { %v3691_v39 = vpop.f32.mrf.mxu1 }
 0x1f1   : > { %v1426_v28 = vadd.f32 %v2661_v24, %v3691_v39  ;;  %v1802_v39 = vld [vmem:[#allocation4] sm:$0xff] }
 0x1f2   : > { %v2907_v40 = vpop.f32.mrf.mxu1 }
 0x295   : > { %v1506_v42 = vpop.f32.mrf.mxu0 }
 0x296   : > { %v1742_v43 = vsel %vm1433_vm6, %v1506_v42, -inf }
 0x297   : > { %1743 = vmax.xlane.f32.xlu0 %v1742_v43  ;;  %v2912_v44 = vpop.f32.mrf.mxu0  ;;  %v1582_v45 = vpop.f32.mrf.mxu1  ;;  %v1803_v43 = vld [vmem:[#allocation4 + $0x8] sm:$0xff] }
 0x298   : > { %v1745_v46 = vsel %vm1433_vm6, %v1582_v45, -inf }
 0x299   : > { %v2917_v47 = vpop.f32.mrf.mxu1 }
 0x29b   : > { %1746 = vmax.xlane.f32.xlu0 %v1745_v46 }
 0x29e   : > { %v1658_v48 = vpop.f32.mrf.mxu0 }
 0x29f   : > { %v1748_v49 = vsel %vm1433_vm6, %v1658_v48, -inf }
 0x2a0   : > { %1749 = vmax.xlane.f32.xlu1 %v1748_v49  ;;  %v2922_v50 = vpop.f32.mrf.mxu0  ;;  %v1804_v49 = vld [vmem:[#allocation4 + $0x10] sm:$0xff] }
 0x2a1   : > { %v1734_v51 = vpop.f32.mrf.mxu1  ;;  %v1831_v50 = vld [vmem:[#allocation5] sm:$0xff] }
 0x2a2   : > { %v1751_v52 = vsel %vm1433_vm6, %v1734_v51, -inf }
 0x2a3   : > { %v2927_v53 = vpop.f32.mrf.mxu1 }
 0x2a4   : > { %1752 = vmax.xlane.f32.xlu1 %v1751_v52 }
 0x320   : > { %v1744_v56 = vpop.xlane.xlu0 %1743 }
 0x321   : > { %v1754_v57 = vmax.f32 %v1738_v55, %v1744_v56 }
 0x323   : > { %v1758_v59 = vsub.f32 %v1738_v55, %v1754_v57  ;;  %2159 = vst.msk [vmem:[#allocation3] sm:$0xff] %vm1826_vm7, %v1754_v57  ;;  %1772 = vperm.xlu0 %3064, %v1754_v57   ;;  %v1832_v55 = vld [vmem:[#allocation5 + $0x8] sm:$0xff] }
 0x324   : > { %v1747_v60 = vpop.xlane.xlu0 %1746 }
 0x325   : > { %v1762_v61 = vmul.f32 1.442695, %v1758_v59  ;;  %v1755_v62 = vmax.f32 %v1739_v58, %v1747_v60 }
 0x327   : > { %3066 = vpow2.f32 %v1762_v61  ;;  %v1759_v63 = vsub.f32 %v1739_v58, %v1755_v62  ;;  %2160 = vst.msk [vmem:[#allocation3 + $0x8] sm:$0xff] %vm1826_vm7, %v1755_v62  ;;  %1777 = vperm.xlu1 %3065, %v1755_v62  }
 0x329   : > { %v1750_v1 = vpop.xlane.xlu1 %1749  ;;  %v1764_v31 = vmul.f32 1.442695, %v1759_v63 }
 0x32a   : > { %v1756_v2 = vmax.f32 %v1740_v0, %v1750_v1 }
 0x32c   : > { %v1760_v4 = vsub.f32 %v1740_v0, %v1756_v2  ;;  %2161 = vst.msk [vmem:[#allocation3 + $0x10] sm:$0xff] %vm1826_vm7, %v1756_v2  ;;  %1782 = vperm.xlu1 %3065, %v1756_v2   ;;  %v1833_v2 = vld [vmem:[#allocation5 + $0x10] sm:$0xff] }
 0x32d   : > { %v1753_v5 = vpop.xlane.xlu1 %1752 }
 0x32e   : > { %v1757_v6 = vmax.f32 %v1741_v3, %v1753_v5  ;;  %v1766_v25 = vmul.f32 1.442695, %v1760_v4 }
 0x330   : > { %v1761_v7 = vsub.f32 %v1741_v3, %v1757_v6  ;;  %2162 = vst.msk [vmem:[#allocation3 + $0x18] sm:$0xff] %vm1826_vm7, %v1757_v6  ;;  %1787 = vperm.xlu1 %3065, %v1757_v6   ;;  %v1834_v6 = vld [vmem:[#allocation5 + $0x18] sm:$0xff] }
 0x332   : > { %v1768_v36 = vmul.f32 1.442695, %v1761_v7 }
 0x334   : > { %v3067_v8 = vpop.eup %3066 }
 0x335   : > { %1837 = vperm.xlu1 %3065, %v3067_v8   ;;  %v1806_v40 = vmul.f32 %v3067_v8, %v1802_v39 }
 0x39e   : > { %v1773_v9 = vpop.permute.xlu0 %1772 }
 0x39f   : > { %v1790_v10 = vsub.f32 %v1506_v42, %v1773_v9 }
 0x3a1   : > { %v1794_v11 = vmul.f32 1.442695, %v1790_v10 }
 0x3a2   : > { %v1778_v12 = vpop.permute.xlu1 %1777 }
 0x3a3   : > { %3068 = vpow2.f32 %v1794_v11  ;;  %v1791_v13 = vsub.f32 %v1582_v45, %v1778_v12 }
 0x3a5   : > { %v1796_v14 = vmul.f32 1.442695, %v1791_v13 }
 0x3a7   : > { %3070 = vpow2.f32 %v1796_v14  ;;  %v1783_v15 = vpop.permute.xlu1 %1782 }
 0x3a8   : > { %v1792_v16 = vsub.f32 %v1658_v48, %v1783_v15 }
 0x3aa   : > { %v1798_v17 = vmul.f32 1.442695, %v1792_v16 }
 0x3ab   : > { %v1788_v18 = vpop.permute.xlu1 %1787 }
 0x3ac   : > { %3072 = vpow2.f32 %v1798_v17  ;;  %v1793_v19 = vsub.f32 %v1734_v51, %v1788_v18 }
 0x3ae   : > { %v1800_v21 = vmul.f32 1.442695, %v1793_v19 }
 0x3b0   : > { %v3069_v22 = vpop.eup %3068  ;;  %3074 = vpow2.f32 %v1800_v21  ;;  %v1838_v38 = vpop.permute.xlu1 %1837 }
 0x3b1   : > { %2931 = vmatmul.mubr.msk.f32.vlgmr.msra.gmra.mxu0 %vm1433_vm6, %v3069_v22  ;;  %v1810_v26 = vsel %vm1433_vm6, %v3069_v22, 0.0  ;;  %3076 = vpow2.f32 %v1766_v25  ;;  %v1855_v52 = vmul.f32 %v1838_v38, %v1831_v50 }
 0x3b2   : > { %2939 = vmatpush3.msra.mxu0 %v1356_v23  ;;  %1811 = vadd.xlane.f32.xlu1 %v1810_v26  ;;  %3078 = vpow2.f32 %v1764_v31 }
 0x3b3   : > { %2940 = vmatprep.mubr.msk.f32.mxu0 %vm3206_vm4, %v3205_v41  ;;  %3080 = vpow2.f32 %v1768_v36 }
 0x3b4   : > { %v3071_v27 = vpop.eup %3070 }
 0x3b5   : > { %2936 = vmatmul.mubr.msk.f32.vlgmr.msra.gmra.mxu1 %vm1433_vm6, %v3071_v27  ;;  %v1813_v29 = vsel %vm1433_vm6, %v3071_v27, 0.0 }
 0x3b6   : > { %2944 = vmatpush3.msra.mxu1 %v1426_v28  ;;  %1814 = vadd.xlane.f32.xlu0 %v1813_v29 }
 0x3b7   : > { %2945 = vmatprep.mubr.msk.f32.mxu1 %vm3206_vm4, %v3205_v41 }
 0x3b9   : > { %v3073_v30 = vpop.eup %3072 }
 0x3ba   : > { %2941 = vmatmul.mubr.msk.f32.vlgmr.msra.gmra.mxu0 %vm1433_vm6, %v3073_v30  ;;  %v1816_v35 = vsel %vm1433_vm6, %v3073_v30, 0.0 }
 0x3bd   : > { %v3075_v32 = vpop.eup %3074 }
 0x3be   : > { %2946 = vmatmul.mubr.msk.f32.vlgmr.msra.gmra.mxu1 %vm1433_vm6, %v3075_v32  ;;  %v3077_v33 = vpop.eup %3076  ;;  %v1819_v37 = vsel %vm1433_vm6, %v3075_v32, 0.0 }
 0x3bf   : > { %v3079_v34 = vpop.eup %3078  ;;  %v1808_v51 = vmul.f32 %v3077_v33, %v1804_v49 }
 0x3c0   : > { %v3081_v41 = vpop.eup %3080  ;;  %v1807_v45 = vmul.f32 %v3079_v34, %v1803_v43 }
 0x3c1   : > { %v1809_v61 = vmul.f32 %v3081_v41, %v1805_v54 }
 0x3c3   : > { %1847 = vperm.xlu1 %3065, %v3077_v33  }
 0x3cc   : > { %1842 = vperm.xlu0 %3064, %v3079_v34  }
 0x3e7   : > { %1817 = vadd.xlane.f32.xlu1 %v1816_v35 }
 0x3eb   : > { %1820 = vadd.xlane.f32.xlu1 %v1819_v37 }
 0x3fc   : > { %1852 = vperm.xlu1 %3065, %v3081_v41  }
 0x43b   : > { %v1812_v42 = vpop.xlane.xlu1 %1811 }
 0x43c   : > { %v1822_v44 = vadd.f32 %v1812_v42, %v1806_v40 }
 0x43e   : > { %1827 = vst.msk [vmem:[#allocation4] sm:$0xff] %vm1826_vm7, %v1822_v44 }
 0x43f   : > { %v1815_v46 = vpop.xlane.xlu0 %1814  ;;  %v1848_v48 = vpop.permute.xlu1 %1847 }
 0x440   : > { %v1823_v47 = vadd.f32 %v1815_v46, %v1807_v45  ;;  %v1857_v5 = vmul.f32 %v1848_v48, %v1833_v2 }
 0x442   : > { %1828 = vst.msk [vmem:[#allocation4 + $0x8] sm:$0xff] %vm1826_vm7, %v1823_v47 }
 0x447   : > { %v1843_v56 = vpop.permute.xlu0 %1842 }
 0x448   : > { %v1856_v62 = vmul.f32 %v1843_v56, %v1832_v55 }
 0x470   : > { %v1818_v53 = vpop.xlane.xlu1 %1817 }
 0x471   : > { %v1824_v57 = vadd.f32 %v1818_v53, %v1808_v51  ;;  %v1928_v58 = vpop.f32.mrf.mxu0 }
 0x472   : > { %v2151_v59 = vadd.f32 %v1928_v58, %v1855_v52 }
 0x473   : > { %1829 = vst.msk [vmem:[#allocation4 + $0x10] sm:$0xff] %vm1826_vm7, %v1824_v57  ;;  %v2932_v60 = vpop.f32.mrf.mxu0 }
 0x474   : > { %2155 = vst.msk [vmem:[#allocation5] sm:$0xff] %vm1433_vm6, %v2151_v59  ;;  %v1821_v63 = vpop.xlane.xlu1 %1820 }
 0x475   : > { %v1825_v0 = vadd.f32 %v1821_v63, %v1809_v61  ;;  %v2001_v1 = vpop.f32.mrf.mxu1 }
 0x476   : > { %v2152_v3 = vadd.f32 %v2001_v1, %v1856_v62 }
 0x477   : > { %1830 = vst.msk [vmem:[#allocation4 + $0x18] sm:$0xff] %vm1826_vm7, %v1825_v0  ;;  %v2937_v4 = vpop.f32.mrf.mxu1 }
 0x478   : > { %2156 = vst.msk [vmem:[#allocation5 + $0x8] sm:$0xff] %vm1433_vm6, %v2152_v3  ;;  %v1853_v7 = vpop.permute.xlu1 %1852 }
 0x479   : > { %v1858_v11 = vmul.f32 %v1853_v7, %v1834_v6 }
 0x47a   : > { %v2074_v8 = vpop.f32.mrf.mxu0 }
 0x47b   : > { %v2153_v9 = vadd.f32 %v2074_v8, %v1857_v5 }
 0x47c   : > { %v2942_v10 = vpop.f32.mrf.mxu0 }
 0x47d   : > { %2157 = vst.msk [vmem:[#allocation5 + $0x10] sm:$0xff] %vm1433_vm6, %v2153_v9  ;;  %2166 = sbr.rel (%p2678_p3) target bundleno = 1502 (0x5de), region = 68 }
 0x47e   : > { %v2147_v12 = vpop.f32.mrf.mxu1 }
 0x47f   : > { %v2154_v13 = vadd.f32 %v2147_v12, %v1858_v11 }
 0x480   : > { %v2947_v14 = vpop.f32.mrf.mxu1 }
 0x481   : > { %2158 = vst.msk [vmem:[#allocation5 + $0x18] sm:$0xff] %vm1433_vm6, %v2154_v13 }
 0x482   : > { %v2169_v15 = vld [vmem:[#allocation4 + $0x10] sm:$0xff]  ;;  %v2168_v16 = vld [vmem:[#allocation4 + $0x8] sm:$0xff]  ;;  %v2170_v17 = vld [vmem:[#allocation4 + $0x18] sm:$0xff]  ;;  %v3208_v18 = vmov 0   ;;  %v3209_v20 = vmov 0.0   ;;  %vm3210_vm8 = vmmov 0  }
 0x483   : > { %3083 = vset.pattern.permute.xlu1 %v3208_v18  ;;  %3082 = vset.pattern.permute.xlu0 %v3208_v18  ;;  %3084 = vrcp.f32 %v2169_v15  ;;  %v2167_v19 = vld [vmem:[#allocation4] sm:$0xff]  ;;  %v2679_v21 = vld [vmem:[%s3819_s8 + $0x8] sm:$0xff]  ;;  %v2682_v32 = vld [vmem:[%s3819_s8 + $0x10] sm:$0xff] }
 0x484   : > { %3086 = vrcp.f32 %v2168_v16  ;;  %2948 = vmatprep.subr.mxu0 %v3209_v20  ;;  %2953 = vmatprep.subr.mxu1 %v3209_v20  ;;  %v2203_v25 = vld [vmem:[%s3819_s8] sm:$0xff]  ;;  %v2176_v27 = vld [vmem:[#allocation5 + $0x8] sm:$0xff]  ;;  %v2177_v28 = vld [vmem:[#allocation5 + $0x10] sm:$0xff] }
 0x485   : > { %3088 = vrcp.f32 %v2170_v17  ;;  %2949 = vmatpush3.msra.mxu0 %v2679_v21  ;;  %2950 = vmatprep.mubr.msk.f32.mxu0 %vm3210_vm8, %v3209_v20  ;;  %v2175_v33 = vld [vmem:[#allocation5] sm:$0xff]  ;;  %v2684_v37 = vld [vmem:[%s3819_s8 + $0x18] sm:$0xff] }
 0x486   : > { %3090 = vrcp.f32 %v2167_v19  ;;  %2958 = vmatprep.subr.mxu0 %v3209_v20  ;;  %2955 = vmatprep.mubr.msk.f32.mxu1 %vm3210_vm8, %v3209_v20  ;;  %v2686_v50 = vld [vmem:[%s3820_s9] ss:$0 sm:$0xff] }
 0x487   : > { %2954 = vmatpush3.msra.mxu1 %v2203_v25 }
 0x488   : > { %2963 = vmatprep.subr.mxu1 %v3209_v20  ;;  %v2178_v41 = vld [vmem:[#allocation5 + $0x18] sm:$0xff] }
 0x490   : > { %v3085_v22 = vpop.eup %3084 }
 0x491   : > { %v3087_v23 = vpop.eup %3086  ;;  %2191 = vperm.xlu1 %3083, %v3085_v22  }
 0x492   : > { %v3089_v24 = vpop.eup %3088  ;;  %2186 = vperm.xlu0 %3082, %v3087_v23  }
 0x493   : > { %v3091_v26 = vpop.eup %3090 }
 0x495   : > { %2196 = vperm.xlu1 %3083, %v3089_v24  }
 0x496   : > { %2181 = vperm.xlu0 %3082, %v3091_v26  }
 0x50c   : > { %v2192_v29 = vpop.permute.xlu1 %2191 }
 0x50d   : > { %v2187_v30 = vpop.permute.xlu0 %2186  ;;  %v2201_v34 = vmul.f32 %v2192_v29, %v2177_v28 }
 0x50e   : > { %v2200_v31 = vmul.f32 %v2187_v30, %v2176_v27 }
 0x510   : > { %2951 = vmatmul.mubr.msk.f32.vlgmr.msra.gmra.mxu0 %vm1433_vm6, %v2200_v31  ;;  %v2197_v38 = vpop.permute.xlu1 %2196 }
 0x511   : > { %v2182_v35 = vpop.permute.xlu0 %2181  ;;  %2959 = vmatpush3.msra.mxu0 %v2682_v32  ;;  %2960 = vmatprep.mubr.msk.f32.mxu0 %vm3210_vm8, %v3209_v20  ;;  %v2202_v39 = vmul.f32 %v2197_v38, %v2178_v41 }
 0x512   : > { %v2199_v36 = vmul.f32 %v2182_v35, %v2175_v33 }
 0x514   : > { %2956 = vmatmul.mubr.msk.f32.vlgmr.msra.gmra.mxu1 %vm1433_vm6, %v2199_v36  ;;  %2961 = vmatmul.mubr.msk.f32.vlgmr.msra.gmra.mxu0 %vm1433_vm6, %v2201_v34 }
 0x515   : > { %2964 = vmatpush3.msra.mxu1 %v2684_v37  ;;  %2965 = vmatprep.mubr.msk.f32.mxu1 %vm3210_vm8, %v3209_v20 }
 0x518   : > { %2966 = vmatmul.mubr.msk.f32.vlgmr.msra.gmra.mxu1 %vm1433_vm6, %v2202_v39 }
 0x5d0   : > { %v2275_v40 = vpop.f32.mrf.mxu0 }
 0x5d2   : > { %v2952_v42 = vpop.f32.mrf.mxu0 }
 0x5d4   : > { %v2348_v43 = vpop.f32.mrf.mxu1  ;;  %v2423_v44 = vpop.f32.mrf.mxu0 }
 0x5d5   : > { %v2349_v45 = vadd.f32 %v2348_v43, %v2275_v40 }
 0x5d6   : > { %v2957_v46 = vpop.f32.mrf.mxu1  ;;  %v2962_v47 = vpop.f32.mrf.mxu0 }
 0x5d7   : > { %v2427_v48 = vadd.f32 %v2423_v44, %v2349_v45 }
 0x5d8   : > { %v2499_v49 = vpop.f32.mrf.mxu1 }
 0x5d9   : > { %v2503_v51 = vadd.f32 %v2499_v49, %v2427_v48 }
 0x5da   : > { %v2967_v52 = vpop.f32.mrf.mxu1 }
 0x5db   : > { %v2511_v53 = vadd.f32 %v2686_v50, %v2503_v51 }
 0x5dd   : > { %2512 = vst.msk [vmem:[%s404_s10] sm:$0xff] %vm821_vm5, %v2511_v53 }
 0x5de PF: > { %s2688_s27 = sshll.u32 %s3184_s18, 1  ;;  %s2529_s29 = sshll.u32 %s404_s10, 4  ;;  %s2530_s29 = int_to_ptr.vmem [resolvable:$true] %s2529_s29 }
 0x5df   : > { %s2525_s19 = sadd.s32 %s3180_s17, %s2688_s27  ;;  %s3848_s30 = sld [smem:[#allocation20_spill]] }
 0x5e0   : > { %s2689_s24 = sshll.u32 %s2525_s19, 7  ;;  %s3849_s11 = sand.u32 1, %s3168_s14  }
 0x5e1   : > { %s2514_s20 = scalar_lea.sflag [#allocation7], %s3849_s11  ;;  %s3092_s21 = scalar_lea.vmem %s2530_s29, 128 }
 0x5e2   : > { %p3093_p4 = scmp.ne.s32.totalorder %s2530_s29, %s3092_s21  ;;  %s3211_s13 = smov [#allocation6]  }
 0x5e3   : > { %s3096_s15 = sshll.u32 %s3211_s13, 4  ;;  %s3097_s15 = int_to_ptr.vmem [resolvable:$false] %s3096_s15 }
 0x5e4   : > { %p3094_p5 = pnand %p3093_p4, %p3329_p6  ;;  %s3098_s18 = scalar_lea.vmem %s3097_s15, 256 }
 0x5e5   : > { %s2527_s16 = scalar_lea.hbm %s3848_s30, %s2689_s24  ;;  %p3099_p9 = scmp.lt.s32.totalorder %s2530_s29, %s3097_s15 }
 0x5e6   : > { %p3095_p8 = pneg %p3094_p5  ;;  %p3100_p10 = scmp.lt.s32.totalorder %s3098_s18, %s3092_s21 }
 0x5e8   : > { %p3101_p11 = por %p3100_p10, %p3099_p9 }
 0x5ea   : > { %p3102_p12 = pnand %p3101_p11, %p3095_p8 }
 0x5ec   : > { %3105 = shalt.err (!%p3102_p12)
}
 0x5ed   : > { %s3106_s10 = scalar_lea.hbm %s2527_s16, 128  ;;  %s3110_s22 = scalar_lea.hbm %s3848_s30, 512 }
 0x5ee   : > { %p3107_p13 = scmp.ne.s32.totalorder %s2527_s16, %s3106_s10  ;;  %p3111_p2 = scmp.lt.s32.totalorder %s2527_s16, %s3848_s30 }
 0x5ef   : > { %p3112_p3 = scmp.lt.s32.totalorder %s3110_s22, %s3106_s10 }
 0x5f0   : > { %p3108_p0 = pnand %p3107_p13, %p3329_p6 }
 0x5f1   : > { %p3113_p4 = por %p3112_p3, %p3111_p2 }
 0x5f2   : > { %p3109_p1 = pneg %p3108_p0 }
 0x5f4   : > { %p3114_p5 = pnand %p3113_p4, %p3109_p1 }
 0x5f6   : > { %3117 = shalt.err (!%p3114_p5)
}
 0x5f7   : > { %2968 = dma.vmem_to_hbm [thread:$0]  (%p3329_p6), %s2530_s29, 128, %s2527_s16, %s2514_s20  }
 0x5f8 PF: > { %s3850_s19 = sld [smem:[#allocation14_spill]] }
 0x5f9   : > { %s3851_s24 = sld [smem:[#allocation9_spill]] }
 0x5fe   : > { %p2974_p8 = scmp.ge.s32.totalorder %s3850_s19, 2 }
 0x5ff   : > { %s2541_s23 = sand.u32 1, %s3851_s24  }
 0x600   : > { %p2971_p9 = pnand %p2974_p8, %p3336_p7  ;;  %s2542_s11 = scalar_lea.sflag [#allocation7], %s2541_s23 }
 0x602   : > { %p2972_p10 = pneg %p2971_p9 }
 0x604   : > { %3159 = dma.done.wait (%p2972_p10), %s2542_s11, 128  }
 0x605   : > { %3161 = vsyncadd (%p2972_p10), %s2542_s11, 4294967168  ;;  %s23_s22 = sadd.s32 1, %s3850_s19   ;;  %s3853_s21 = sld [smem:[#allocation10_spill]] }
 0x606   : > { %p20_p11 = scmp.ge.s32.totalorder %s23_s22, 10   ;;  %s3854_s15 = sld [smem:[#allocation19_spill]] }
 0x607   : > { %s3855_s16 = sld [smem:[#allocation11_spill]]  ;;  %s3861_s13 = smov %s3168_s14 }
 0x608   : > { %s3856_s17 = sld [smem:[#allocation12_spill]] }
 0x609   : > { %s3857_s18 = sld [smem:[#allocation13_spill]] }
 0x60a   : > { %s3858_s19 = sld [smem:[#allocation15_spill]] }
 0x60b   : > { %s3859_s20 = sld [smem:[#allocation16_spill]]  ;;  %s3862_s14 = smov %s3853_s21 }
 0x60c   : > { %s3860_s28 = sld [smem:[#allocation18_spill]] }
 0x60e   :  { %22 = sbr.rel (!%p20_p11) target bundleno = 8 (0x8), region = 109 }
 0x612   : > { %s3863_s21 = smov %s3860_s28 }
 0x613   :  { %2547 = vsyncpa [#allocation7], 1 }
 0x614   :  { %2549 = vsyncpa [#allocation7 + $0x1], 1 }

</bundles_post_ra>
